<compile_context>
chip_gen: v7x
topology: tpu7x:2x2x1
jax: 0.10.0
libtpu: 0.0.40
codegen_flags: <defaults>
</compile_context>

<pallas_src>
import jax
import jax.numpy as jnp
from jax import lax
from jax.experimental import pallas as pl
from jax.experimental.pallas import tpu as pltpu

# Module hyper-parameters (globals in the PyTorch source)
BLOCK_SIZE = 64          # max sequence length for the causal mask
EMBED_SIZE = 256         # embedding dimension C
HEAD_SIZE = 64           # head_size used to instantiate Head (embed_size // 4)


def _head_kernel(x_ref, w_ref, out_ref):
    """One grid step = one tile of batch rows. Fused QKV + attention."""
    bt, T, C = x_ref.shape
    HS = out_ref.shape[-1]

    # Fused K/Q/V projection: one (bt*T, C) @ (C, 3*HS) MXU matmul,
    # bf16 operands, f32 accumulation.  The (bt,T,C)->(bt*T,C) reshape only
    # merges leading dims (lane dim untouched) so it is layout-free.
    x2d = x_ref[...].reshape(bt * T, C)
    kqv = jnp.dot(x2d, w_ref[...], preferred_element_type=jnp.float32)
    kqv = kqv.reshape(bt, T, 3 * HS)

    k = kqv[:, :, 0 * HS:1 * HS].astype(jnp.bfloat16)
    q = kqv[:, :, 1 * HS:2 * HS].astype(jnp.bfloat16)   # C**-0.5 pre-folded into Wq
    v = kqv[:, :, 2 * HS:3 * HS].astype(jnp.bfloat16)

    # scores = k @ q^T (reference module's ordering), batched over bt,
    # contraction on the last dim of both operands (no transposes).
    s = lax.dot_general(
        k, q,
        dimension_numbers=(((2,), (2,)), ((0,), (0,))),
        preferred_element_type=jnp.float32)              # (bt, T, T)

    # Causal mask built in-kernel (replaces the DMA'd tril buffer).
    row = lax.broadcasted_iota(jnp.int32, (T, T), 0)
    col = lax.broadcasted_iota(jnp.int32, (T, T), 1)
    s = jnp.where((col <= row)[None, :, :], s, -jnp.inf)

    # Numerically-stable softmax in f32; divide -> EUP reciprocal.
    m = jnp.max(s, axis=-1, keepdims=True)
    e = jnp.exp(s - m)
    p = e * pl.reciprocal(jnp.sum(e, axis=-1, keepdims=True), approx=True)

    out = lax.dot_general(
        p.astype(jnp.bfloat16), v,
        dimension_numbers=(((2,), (1,)), ((0,), (0,))),
        preferred_element_type=jnp.float32)              # (bt, T, HS)
    out_ref[...] = out.astype(out_ref.dtype)


def head_forward(x, wk, wq, wv):
    """x: (B, T, C) f32; wk/wq/wv: (head_size, C) f32 (PyTorch Linear layout)."""
    B, T, C = x.shape
    HS = wk.shape[0]
    scale = C ** (-0.5)

    # Pre-transpose to (C, HS), fold the logit scale into Wq, fuse K|Q|V into a
    # single (C, 3*HS) weight, and cast operands to bf16 for the MXU.
    w_kqv = jnp.concatenate([wk.T, (wq * scale).T, wv.T], axis=1).astype(jnp.bfloat16)
    x_bf = x.astype(jnp.bfloat16)

    # Batch tile: target M = bt*T near 256 to fill MXU rows, but keep at least
    # 2 parallel grid blocks (v7x megacore) whenever B >= 2.
    bt = max(1, min(B, max(1, 256 // T)))
    while bt > 1 and (B % bt != 0 or B // bt < 2):
        bt -= 1
    grid = (B // bt,)

    return pl.pallas_call(
        _head_kernel,
        out_shape=jax.ShapeDtypeStruct((B, T, HS), jnp.float32),
        grid_spec=pltpu.PrefetchScalarGridSpec(
            num_scalar_prefetch=0,
            grid=grid,
            in_specs=[
                pl.BlockSpec((bt, T, C), lambda i: (i, 0, 0)),       # x batch tile
                pl.BlockSpec((C, 3 * HS), lambda i: (0, 0)),         # fused K|Q|V weights
            ],
            out_specs=pl.BlockSpec((bt, T, HS), lambda i: (i, 0, 0)),
        ),
        compiler_params=pltpu.CompilerParams(
            dimension_semantics=("parallel",),
        ),
    )(x_bf, w_kqv)


def _reference(x, wk, wq, wv):
    """Plain-JAX f32 reference mirroring the PyTorch Head.forward."""
    B, T, C = x.shape
    k = x @ wk.T
    q = x @ wq.T
    v = x @ wv.T
    s = (k @ jnp.swapaxes(q, -2, -1)) * (C ** -0.5)
    tril = jnp.tril(jnp.ones((T, T), dtype=jnp.float32))
    s = jnp.where(tril == 0.0, -jnp.inf, s)
    p = jax.nn.softmax(s, axis=-1)
    return p @ v


if __name__ == "__main__":
    B, T, C = 2, BLOCK_SIZE, EMBED_SIZE       # (2, 64, 256)

    key = jax.random.PRNGKey(0)
    kx, kk, kq, kv = jax.random.split(key, 4)
    x = jax.random.normal(kx, (B, T, C), dtype=jnp.float32)

    # Deterministic Linear-like init: U(-1/sqrt(C), 1/sqrt(C))
    lim = 1.0 / jnp.sqrt(jnp.float32(C))
    wk = jax.random.uniform(kk, (HEAD_SIZE, C), jnp.float32, -lim, lim)
    wq = jax.random.uniform(kq, (HEAD_SIZE, C), jnp.float32, -lim, lim)
    wv = jax.random.uniform(kv, (HEAD_SIZE, C), jnp.float32, -lim, lim)

    out = head_forward(x, wk, wq, wv)
    out = jax.block_until_ready(out)

    ref = _reference(x, wk, wq, wv)
    assert out.shape == (B, T, HEAD_SIZE)
    # bf16 MXU operands (f32 accumulation) vs. full-f32 reference -> 2e-2 tol.
    assert jnp.allclose(out, ref, rtol=2e-2, atol=2e-2), "mismatch vs reference"

    print("KERNEL_OK")
</pallas_src>

<mosaic_0001>
module attributes {stable_mosaic.version = 11 : i64} {
  func.func @_head_kernel(%arg0: i32, %arg1: memref<1x64x256xbf16, #tpu.memory_space<vmem>>, %arg2: memref<256x192xbf16, #tpu.memory_space<vmem>>, %arg3: memref<1x64x64xf32, #tpu.memory_space<vmem>>) attributes {dimension_semantics = [#tpu.dimension_semantics<parallel>], iteration_bounds = array<i64: 2>, scalar_prefetch = 0 : i64, scratch_operands = 0 : i64, tpu.core_type = #tpu.core_type<tc>, window_params = [{transform_indices = @transform_0, window_bounds = array<i64: 1, 64, 256>}, {pipeline_mode = #tpu.pipeline_mode<synchronous>, transform_indices = @transform_1, window_bounds = array<i64: 256, 192>}, {transform_indices = @transform_2, window_bounds = array<i64: 1, 64, 64>}]} {
    %c0 = arith.constant 0 : index
    %c0_0 = arith.constant 0 : index
    %c0_1 = arith.constant 0 : index
    %0 = vector.load %arg1[%c0, %c0_0, %c0_1] : memref<1x64x256xbf16, #tpu.memory_space<vmem>>, vector<1x64x256xbf16>
    %1 = vector.shape_cast %0 : vector<1x64x256xbf16> to vector<64x256xbf16>
    %c0_2 = arith.constant 0 : index
    %c0_3 = arith.constant 0 : index
    %2 = vector.load %arg2[%c0_2, %c0_3] : memref<256x192xbf16, #tpu.memory_space<vmem>>, vector<256x192xbf16>
    %cst = arith.constant dense<0.000000e+00> : vector<64x192xf32>
    %3 = tpu.matmul %1, %2, %cst {dimension_numbers = #tpu.dot_dimension_numbers<[1], [0], [0], [1], [0, 0, 1, 1], [], []>} : vector<64x256xbf16>, vector<256x192xbf16>, vector<64x192xf32> -> vector<64x192xf32>
    %4 = vector.shape_cast %3 : vector<64x192xf32> to vector<1x64x192xf32>
    %5 = vector.extract_strided_slice %4 {offsets = [0, 0, 0], sizes = [1, 64, 64], strides = [1, 1, 1]} : vector<1x64x192xf32> to vector<1x64x64xf32>
    %6 = arith.truncf %5 : vector<1x64x64xf32> to vector<1x64x64xbf16>
    %7 = vector.extract_strided_slice %4 {offsets = [0, 0, 64], sizes = [1, 64, 64], strides = [1, 1, 1]} : vector<1x64x192xf32> to vector<1x64x64xf32>
    %8 = arith.truncf %7 : vector<1x64x64xf32> to vector<1x64x64xbf16>
    %9 = vector.extract_strided_slice %4 {offsets = [0, 0, 128], sizes = [1, 64, 64], strides = [1, 1, 1]} : vector<1x64x192xf32> to vector<1x64x64xf32>
    %10 = arith.truncf %9 : vector<1x64x64xf32> to vector<1x64x64xbf16>
    %cst_4 = arith.constant dense<0.000000e+00> : vector<1x64x64xf32>
    %11 = tpu.matmul %6, %8, %cst_4 {dimension_numbers = #tpu.dot_dimension_numbers<[2], [2], [1], [1], [0, 0, 0, 1, 1, 1], [0], [0]>} : vector<1x64x64xbf16>, vector<1x64x64xbf16>, vector<1x64x64xf32> -> vector<1x64x64xf32>
    %12 = tpu.iota {dimensions = array<i32: 0>} : vector<64x64xi32>
    %13 = tpu.iota {dimensions = array<i32: 1>} : vector<64x64xi32>
    %14 = arith.cmpi sle, %13, %12 : vector<64x64xi32>
    %15 = vector.shape_cast %14 : vector<64x64xi1> to vector<1x64x64xi1>
    %cst_5 = arith.constant 0xFF800000 : f32
    %16 = vector.broadcast %cst_5 : f32 to vector<1x64x64xf32>
    %17 = arith.select %15, %11, %16 : vector<1x64x64xi1>, vector<1x64x64xf32>
    %cst_6 = arith.constant dense<0xFF800000> : vector<1x64xf32>
    %18 = vector.multi_reduction <maximumf>, %17, %cst_6 [2] : vector<1x64x64xf32> to vector<1x64xf32>
    %19 = vector.shape_cast %18 : vector<1x64xf32> to vector<1x64x1xf32>
    %20 = vector.broadcast %19 : vector<1x64x1xf32> to vector<1x64x64xf32>
    %21 = arith.subf %17, %20 : vector<1x64x64xf32>
    %22 = math.exp %21 : vector<1x64x64xf32>
    %cst_7 = arith.constant dense<0.000000e+00> : vector<1x64xf32>
    %23 = vector.multi_reduction <add>, %22, %cst_7 [2] : vector<1x64x64xf32> to vector<1x64xf32>
    %24 = vector.shape_cast %23 : vector<1x64xf32> to vector<1x64x1xf32>
    %25 = tpu.reciprocal %24 {approx = true} : vector<1x64x1xf32> -> vector<1x64x1xf32>
    %26 = vector.broadcast %25 : vector<1x64x1xf32> to vector<1x64x64xf32>
    %27 = arith.mulf %22, %26 : vector<1x64x64xf32>
    %28 = arith.truncf %27 : vector<1x64x64xf32> to vector<1x64x64xbf16>
    %cst_8 = arith.constant dense<0.000000e+00> : vector<1x64x64xf32>
    %29 = tpu.matmul %28, %10, %cst_8 {dimension_numbers = #tpu.dot_dimension_numbers<[2], [1], [1], [2], [0, 0, 0, 1, 1, 2], [0], [0]>} : vector<1x64x64xbf16>, vector<1x64x64xbf16>, vector<1x64x64xf32> -> vector<1x64x64xf32>
    %c0_9 = arith.constant 0 : index
    %c0_10 = arith.constant 0 : index
    %c0_11 = arith.constant 0 : index
    %30 = vector.load %arg3[%c0_9, %c0_10, %c0_11] : memref<1x64x64xf32, #tpu.memory_space<vmem>>, vector<1x64x64xf32>
    tpu.vector_store %arg3[%c0_9, %c0_10, %c0_11], %29 {strides = array<i32>} : memref<1x64x64xf32, #tpu.memory_space<vmem>>, vector<1x64x64xf32>,
    return
  }
  func.func @transform_0(%arg0: i32) -> (i32, i32, i32) {
    %c0_i32 = arith.constant 0 : i32
    %c0_i32_0 = arith.constant 0 : i32
    %c0_i32_1 = arith.constant 0 : i32
    return %arg0, %c0_i32, %c0_i32_0 : i32, i32, i32
  }
  func.func @transform_1(%arg0: i32) -> (i32, i32) {
    %c0_i32 = arith.constant 0 : i32
    %c0_i32_0 = arith.constant 0 : i32
    %c0_i32_1 = arith.constant 0 : i32
    return %c0_i32, %c0_i32_0 : i32, i32
  }
  func.func @transform_2(%arg0: i32) -> (i32, i32, i32) {
    %c0_i32 = arith.constant 0 : i32
    %c0_i32_0 = arith.constant 0 : i32
    %c0_i32_1 = arith.constant 0 : i32
    return %arg0, %c0_i32, %c0_i32_0 : i32, i32, i32
  }
}

</mosaic_0001>

<bundles_post_ra>
// kernel: tpu_custom_call.1
= control target key start
LH: loop header
LB: loop body
LE: loop exit
PB: predicated region body
PF: predicated region fallthrough
CT: control target
= control target key end

     0   :  { %7 = vsyncpa [#allocation3], 0  ;;  %s1426_s0 = inlined_call_operand.vmem [shape: bf16[2,64,256], index: 0, kind: input, shape index: {}]   ;;  %s1427_s1 = inlined_call_operand.vmem [shape: bf16[256,192], index: 1, kind: input, shape index: {}]   ;;  %s1428_s2 = inlined_call_operand.hbm [shape: f32[2,64,64], index: 2, kind: output, shape index: {}]  }
   0x1   :  { %9 = vsyncpa [#allocation3 + $0x1], 0  ;;  %s1177_s9 = smov 0   ;;  %s1179_s10 = smov 0  }
   0x2   :  { %s1181_s11 = smov 0   ;;  %s1183_s12 = smov 0  }
   0x3 LB: > { %s1198_s13 = sadd.s32 4294967295, %s1156_s12   ;;  %s846_s14 = sadd.s32 4294967294, %s1156_s12   ;;  %s1156_s12 = sphi %s1183_s12, %s1434_s12   ;;  %s1152_s11 = sphi %s1181_s11, %s1433_s11   ;;  %s1148_s10 = sphi %s1179_s10, %s1432_s10   ;;  %s1144_s9 = sphi %s1177_s9, %s1431_s9  }
   0x4   : > { %s1202_s15 = sadd.s32 1, %s1156_s12   ;;  %s69_s16 = sadd.s32 1, %s1152_s11 }
   0x5   : > { %s66_s17 = ssub.s32 %s1156_s12, %s1202_s15  ;;  %p79_p0 = scmp.ne.s32.totalorder %s1152_s11, %s1148_s10 }
   0x6   : > { %p67_p1 = scmp.eq.s32.totalorder %s66_s17, 0  ;;  %p80_p2 = scmp.eq.s32.totalorder %s1198_s13, 1 }
   0x7   : > { %p85_p3 = scmp.ne.s32.totalorder %s1148_s10, %s1144_s9  ;;  %p86_p4 = scmp.eq.s32.totalorder %s846_s14, 1 }
   0x8   : > { %s1213_s18 = scalar_select %p67_p1, %s1152_s11, %s69_s16  }
   0x9   : > { %p1215_p5 = por %p80_p2, %p79_p0  ;;  %p1219_p6 = por %p86_p4, %p85_p3 }
   0xa   : > { %p849_p7 = scmp.ge.s32.totalorder %s1156_s12, 1  ;;  %p115_p8 = scmp.lt.s32.totalorder %s1156_s12, 3 }
   0xc   : > { %p116_p9 = pnand %p849_p7, %p115_p8 }
   0xd   : > { %v1002_v0 = vld [vmem:[%s1427_s1 + $0x4] ss:$8 sps:$4 sm:$0xff] (!%p116_p9)   ;;  %v1004_v1 = vld [vmem:[%s1427_s1] ss:$8 sps:$4 sm:$0xff] (!%p116_p9)   ;;  %v1005_v2 = vld [vmem:[%s1427_s1 + $0x14] ss:$8 sps:$4 sm:$0xff] (!%p116_p9)  }
   0xe   : > { %119 = sbr.rel (%p116_p9) target bundleno = 1219 (0x4c3), region = 28  ;;  %383 = vmatprep.subr.bf16.mxu0 (!%p116_p9), %v1002_v0  ;;  %v1007_v3 = vld [vmem:[%s1427_s1 + $0x10] ss:$8 sps:$4 sm:$0xff] (!%p116_p9)   ;;  %v1008_v4 = vld [vmem:[%s1427_s1 + $0x24] ss:$8 sps:$4 sm:$0xff] (!%p116_p9)   ;;  %p137_p10 = scmp.lt.s32.totalorder (!%p116_p9), %s1198_s13, 1 }
   0xf   : > { %384 = vmatpush1.bf16.msra.mxu0 (!%p116_p9), %v1004_v1  ;;  %v1010_v5 = vld [vmem:[%s1427_s1 + $0x20] ss:$8 sps:$4 sm:$0xff] (!%p116_p9)   ;;  %v1011_v6 = vld [vmem:[%s1427_s1 + $0x34] ss:$8 sps:$4 sm:$0xff] (!%p116_p9)   ;;  %v1013_v7 = vld [vmem:[%s1427_s1 + $0x30] ss:$8 sps:$4 sm:$0xff] (!%p116_p9)  }
  0x10   : > { %385 = vmatprep.subr.bf16.mxu0 (!%p116_p9), %v1005_v2  ;;  %v1014_v8 = vld [vmem:[%s1427_s1 + $0x44] ss:$8 sps:$4 sm:$0xff] (!%p116_p9)   ;;  %v1016_v9 = vld [vmem:[%s1427_s1 + $0x40] ss:$8 sps:$4 sm:$0xff] (!%p116_p9)   ;;  %v1017_v10 = vld [vmem:[%s1427_s1 + $0x54] ss:$8 sps:$4 sm:$0xff] (!%p116_p9)  }
  0x11   : > { %v1019_v11 = vld [vmem:[%s1427_s1 + $0x50] ss:$8 sps:$4 sm:$0xff] (!%p116_p9)   ;;  %v1020_v12 = vld [vmem:[%s1427_s1 + $0x64] ss:$8 sps:$4 sm:$0xff] (!%p116_p9)   ;;  %v1022_v14 = vld [vmem:[%s1427_s1 + $0x60] ss:$8 sps:$4 sm:$0xff] (!%p116_p9)  }
  0x12   : > { %v1023_v15 = vld [vmem:[%s1427_s1 + $0x74] ss:$8 sps:$4 sm:$0xff] (!%p116_p9)   ;;  %v1025_v16 = vld [vmem:[%s1427_s1 + $0x70] ss:$8 sps:$4 sm:$0xff] (!%p116_p9)   ;;  %v1026_v17 = vld [vmem:[%s1427_s1 + $0x84] ss:$8 sps:$4 sm:$0xff] (!%p116_p9)  }
  0x13   : > { %386 = vmatpush1.bf16.msra.mxu0 (!%p116_p9), %v1007_v3  ;;  %v1028_v18 = vld [vmem:[%s1427_s1 + $0x80] ss:$8 sps:$4 sm:$0xff] (!%p116_p9)   ;;  %v1029_v19 = vld [vmem:[%s1427_s1 + $0x94] ss:$8 sps:$4 sm:$0xff] (!%p116_p9)   ;;  %v1031_v20 = vld [vmem:[%s1427_s1 + $0x90] ss:$8 sps:$4 sm:$0xff] (!%p116_p9)  }
  0x14   : > { %387 = vmatprep.subr.bf16.mxu0 (!%p116_p9), %v1008_v4  ;;  %v1032_v21 = vld [vmem:[%s1427_s1 + $0xa4] ss:$8 sps:$4 sm:$0xff] (!%p116_p9)   ;;  %v1034_v22 = vld [vmem:[%s1427_s1 + $0xa0] ss:$8 sps:$4 sm:$0xff] (!%p116_p9)   ;;  %v1035_v23 = vld [vmem:[%s1427_s1 + $0xb4] ss:$8 sps:$4 sm:$0xff] (!%p116_p9)  }
  0x15   : > { %s138_s17 = scalar_select %p137_p10, %s1198_s13, 1  ;;  %v1037_v24 = vld [vmem:[%s1427_s1 + $0xb0] ss:$8 sps:$4 sm:$0xff]   ;;  %v1038_v25 = vld [vmem:[%s1427_s1 + $0xc4] ss:$8 sps:$4 sm:$0xff]   ;;  %vm476_vm0 = vcmask 523264  }
  0x16   : > { %v1040_v26 = vld [vmem:[%s1427_s1 + $0xc0] ss:$8 sps:$4 sm:$0xff]   ;;  %v1041_v27 = vld [vmem:[%s1427_s1 + $0xd4] ss:$8 sps:$4 sm:$0xff]   ;;  %v1043_v28 = vld [vmem:[%s1427_s1 + $0xd0] ss:$8 sps:$4 sm:$0xff]  }
  0x17   : > { %388 = vmatpush1.bf16.msra.mxu0 %v1010_v5  ;;  %s906_s25 = sshll.u32 %s138_s17, 6  ;;  %v1044_v29 = vld [vmem:[%s1427_s1 + $0xe4] ss:$8 sps:$4 sm:$0xff]   ;;  %v1046_v30 = vld [vmem:[%s1427_s1 + $0xe0] ss:$8 sps:$4 sm:$0xff]   ;;  %s1158_s7 = smov 64  }
  0x18   : > { %389 = vmatprep.subr.bf16.mxu0 %v1011_v6  ;;  %s1266_s30 = scalar_lea.vmem %s1426_s0, %s906_s25  ;;  %v1047_v31 = vld [vmem:[%s1427_s1 + $0xf4] ss:$8 sps:$4 sm:$0xff]   ;;  %v1049_v32 = vld [vmem:[%s1427_s1 + $0xf0] ss:$8 sps:$4 sm:$0xff]   ;;  %s907_s16 = sshll.u32 %s1198_s13, 10 }
  0x19   : > { %v1052_v13 = vld [vmem:[%s1266_s30 + $0x4] ss:$8 sps:$4 sm:$0xff]   ;;  %v1050_v33 = vld [vmem:[%s1266_s30] ss:$8 sps:$4 sm:$0xff]   ;;  %v1053_v34 = vld [vmem:[%s1266_s30 + $0x14] ss:$8 sps:$4 sm:$0xff]   ;;  %s1378_s23 = scalar_lea.hbm %s1428_s2, %s907_s16 }
  0x1a   : > { %415 = vmatprep.mubr.bf16.mxu0 %v1052_v13  ;;  %v1055_v35 = vld [vmem:[%s1266_s30 + $0x10] ss:$8 sps:$4 sm:$0xff]   ;;  %v1056_v36 = vld [vmem:[%s1266_s30 + $0x24] ss:$8 sps:$4 sm:$0xff]   ;;  %v1058_v37 = vld [vmem:[%s1266_s30 + $0x20] ss:$8 sps:$4 sm:$0xff]  }
  0x1b   : > { %390 = vmatpush1.bf16.msra.mxu0 %v1013_v7  ;;  %v1059_v38 = vld [vmem:[%s1266_s30 + $0x34] ss:$8 sps:$4 sm:$0xff]   ;;  %v1061_v39 = vld [vmem:[%s1266_s30 + $0x30] ss:$8 sps:$4 sm:$0xff]   ;;  %s134_s30 = sand.u32 1, %s1148_s10   ;;  %s1159_s25 = smov [#allocation2]  }
  0x1c   : > { %391 = vmatprep.subr.bf16.mxu0 %v1014_v8  ;;  %v566_v8 = vlaneseq  ;;  %s850_s8 = sshll.u32 %s134_s30, 6  ;;  %s1385_s13 = scalar_lea.sflag [#allocation3], %s134_s30 }
  0x1d   : > { %s136_s14 = scalar_lea.vmem [#allocation2], %s850_s8  ;;  %s1098_s26 = sshll.u32 %s1159_s25, 4  ;;  %s1099_s26 = int_to_ptr.vmem [resolvable:$false] %s1098_s26 }
  0x1e   : > { %s784_s17 = sshll.u32 %s136_s14, 4  ;;  %s1100_s27 = scalar_lea.vmem %s1099_s26, 2048  ;;  %s1380_s17 = int_to_ptr.vmem [resolvable:$true] %s784_s17 }
  0x1f   : > { %392 = vmatpush1.bf16.msra.mxu0 %v1016_v9  ;;  %v567_v9 = vshrl.u32 %v566_v8, 7  ;;  %s1094_s24 = scalar_lea.vmem %s1380_s17, 1024  ;;  %p1101_p0 = scmp.lt.s32.totalorder %s1380_s17, %s1099_s26 }
  0x20   : > { %393 = vmatprep.subr.bf16.mxu0 %v1017_v10  ;;  %v576_v10 = vand.u32 127, %v566_v8  ;;  %p1095_p11 = scmp.ne.s32.totalorder %s1380_s17, %s1094_s24  ;;  %p1102_p1 = scmp.lt.s32.totalorder %s1100_s27, %s1094_s24 }
  0x22   : > { %vm577_vm1 = vcmp.le.s32.totalorder %v576_v10, %v567_v9  ;;  %p1096_p12 = pnand %p1095_p11, %p1215_p5  ;;  %p1103_p2 = por %p1102_p1, %p1101_p0 }
  0x23   : > { %394 = vmatpush1.bf16.msra.mxu0 %v1019_v11  ;;  %v569_v11 = vadd.s32 16, %v567_v9 }
  0x24   : > { %395 = vmatprep.subr.bf16.mxu0 %v1020_v12  ;;  %v568_v12 = vadd.s32 8, %v567_v9  ;;  %p1097_p13 = pneg %p1096_p12 }
  0x25   : > { %vm579_vm2 = vcmp.le.s32.totalorder %v576_v10, %v569_v11 }
  0x26   : > { %vm578_vm3 = vcmp.le.s32.totalorder %v576_v10, %v568_v12  ;;  %p1104_p3 = pnand %p1103_p2, %p1097_p13 }
  0x27   : > { %396 = vmatpush1.bf16.msra.mxu0 %v1022_v14 }
  0x28   : > { %397 = vmatprep.subr.bf16.mxu0 %v1023_v15  ;;  %v570_v15 = vadd.s32 24, %v567_v9 }
  0x2a   : > { %vm580_vm4 = vcmp.le.s32.totalorder %v576_v10, %v570_v15 }
  0x2b   : > { %398 = vmatpush1.bf16.msra.mxu0 %v1025_v16 }
  0x2c   : > { %399 = vmatprep.subr.bf16.mxu0 %v1026_v17 }
  0x2f   : > { %400 = vmatpush1.bf16.msra.mxu0 %v1028_v18 }
  0x30   : > { %401 = vmatprep.subr.bf16.mxu0 %v1029_v19 }
  0x33   : > { %402 = vmatpush1.bf16.msra.mxu0 %v1031_v20  ;;  %v571_v20 = vadd.s32 32, %v567_v9 }
  0x34   : > { %403 = vmatprep.subr.bf16.mxu0 %v1032_v21 }
  0x35   : > { %vm581_vm5 = vcmp.le.s32.totalorder %v576_v10, %v571_v20 }
  0x37   : > { %404 = vmatpush1.bf16.msra.mxu0 %v1034_v22 }
  0x38   : > { %405 = vmatprep.subr.bf16.mxu0 %v1035_v23 }
  0x3b   : > { %406 = vmatpush1.bf16.msra.mxu0 %v1037_v24  ;;  %v573_v24 = vadd.s32 48, %v567_v9 }
  0x3c   : > { %407 = vmatprep.subr.bf16.mxu0 %v1038_v25  ;;  %v572_v25 = vadd.s32 40, %v567_v9 }
  0x3d   : > { %vm583_vm6 = vcmp.le.s32.totalorder %v576_v10, %v573_v24 }
  0x3e   : > { %vm582_vm7 = vcmp.le.s32.totalorder %v576_v10, %v572_v25 }
  0x3f   : > { %408 = vmatpush1.bf16.msra.mxu0 %v1040_v26 }
  0x40   : > { %409 = vmatprep.subr.bf16.mxu0 %v1041_v27 }
  0x43   : > { %410 = vmatpush1.bf16.msra.mxu0 %v1043_v28 }
  0x44   : > { %411 = vmatprep.subr.bf16.mxu0 %v1044_v29 }
  0x47   : > { %412 = vmatpush1.bf16.msra.mxu0 %v1046_v30  ;;  %v574_v30 = vadd.s32 56, %v567_v9 }
  0x48   : > { %413 = vmatprep.subr.bf16.mxu0 %v1047_v31 }
  0x49   : > { %vm584_vm8 = vcmp.le.s32.totalorder %v576_v10, %v574_v30 }
  0x4b   : > { %414 = vmatpush1.bf16.msra.mxu0 %v1049_v32 }
  0x4e   : > { %416 = vmatmul.mubr.bf16.vlgmr.msra.gmra.mrb[0].mxu0 %v1050_v33 }
  0x4f   : > { %425 = vmatprep.mubr.bf16.mxu0 %v1053_v34 }
  0x56   : > { %426 = vmatmul.mubr.bf16.gmra.mrb[4].mxu0 %v1055_v35 }
  0x57   : > { %435 = vmatprep.mubr.bf16.mxu0 %v1056_v36 }
  0x5e   : > { %436 = vmatmul.mubr.bf16.gmra.mrb[8].mxu0 %v1058_v37 }
  0x5f   : > { %445 = vmatprep.mubr.bf16.mxu0 %v1059_v38 }
  0x66   : > { %446 = vmatmul.mubr.bf16.gmra.mrb[12].mxu0 %v1061_v39 }
 0x121   : > { %v417_v40 = vpop.f32.mrb[0].mxu0 }
 0x122   : > { %v419_v41 = vpop.f32.mrb[1].mxu0 }
 0x123   : > { %v421_v42 = vpop.f32.mrb[2].mxu0 }
 0x124   : > { %v456_v43 = vpack.c.bf16 %v421_v42, %v417_v40  ;;  %v423_v44 = vpop.f32.mrb[3].mxu0 }
 0x125   : > { %v460_v45 = vpack.c.bf16 %v423_v44, %v419_v41 }
 0x126   : > { %468 = vrot.lane.b32.xlu0 %v456_v43, %s1158_s7  ;;  %932 = vmatprep.mubr.msk.bf16.mxu1 %vm476_vm0, %v456_v43 }
 0x129   : > { %v427_v46 = vpop.f32.mrb[4].mxu0 }
 0x12a   : > { %v429_v47 = vpop.f32.mrb[5].mxu0 }
 0x12b   : > { %v431_v48 = vpop.f32.mrb[6].mxu0 }
 0x12c   : > { %v457_v49 = vpack.c.bf16 %v431_v48, %v427_v46  ;;  %v433_v50 = vpop.f32.mrb[7].mxu0 }
 0x12d   : > { %v461_v51 = vpack.c.bf16 %v433_v50, %v429_v47 }
 0x12e   : > { %470 = vrot.lane.b32.xlu0 %v457_v49, %s1158_s7 }
 0x131   : > { %v437_v52 = vpop.f32.mrb[8].mxu0 }
 0x132   : > { %v439_v53 = vpop.f32.mrb[9].mxu0 }
 0x133   : > { %v441_v54 = vpop.f32.mrb[10].mxu0 }
 0x134   : > { %v458_v55 = vpack.c.bf16 %v441_v54, %v437_v52  ;;  %v443_v56 = vpop.f32.mrb[11].mxu0 }
 0x135   : > { %v462_v57 = vpack.c.bf16 %v443_v56, %v439_v53 }
 0x136   : > { %472 = vrot.lane.b32.xlu1 %v458_v55, %s1158_s7 }
 0x139   : > { %v447_v58 = vpop.f32.mrb[12].mxu0 }
 0x13a   : > { %v449_v59 = vpop.f32.mrb[13].mxu0 }
 0x13b   : > { %v451_v60 = vpop.f32.mrb[14].mxu0 }
 0x13c   : > { %v459_v61 = vpack.c.bf16 %v451_v60, %v447_v58  ;;  %v453_v62 = vpop.f32.mrb[15].mxu0 }
 0x13d   : > { %v463_v63 = vpack.c.bf16 %v453_v62, %v449_v59 }
 0x13e   : > { %474 = vrot.lane.b32.xlu1 %v459_v61, %s1158_s7 }
 0x198   : > { %v469_v0 = vpop.permute.xlu0 %468 }
 0x199   : > { %956 = vmatprep.subr.msk.bf16.mxu1 %vm476_vm0, %v469_v0  ;;  %v490_v1 = vsel %vm476_vm0, %v469_v0, 0 }
 0x19a   : > { %925 = vmatpush3.bf16.xpose.msra.mxu1 %v490_v1 }
 0x1a0   : > { %v471_v2 = vpop.permute.xlu0 %470 }
 0x1a1   : > { %957 = vmatprep.subr.msk.bf16.mxu1 %vm476_vm0, %v471_v2  ;;  %v493_v3 = vsel %vm476_vm0, %v471_v2, 0 }
 0x1a2   : > { %927 = vmatpush3.bf16.xpose.msra.mxu1 %v493_v3 }
 0x1a8   : > { %v473_v4 = vpop.permute.xlu1 %472 }
 0x1a9   : > { %958 = vmatprep.subr.msk.bf16.mxu1 %vm476_vm0, %v473_v4  ;;  %v496_v5 = vsel %vm476_vm0, %v473_v4, 0 }
 0x1aa   : > { %929 = vmatpush3.bf16.xpose.msra.mxu1 %v496_v5 }
 0x1b0   : > { %v475_v6 = vpop.permute.xlu1 %474 }
 0x1b1   : > { %959 = vmatprep.subr.msk.bf16.mxu1 %vm476_vm0, %v475_v6  ;;  %v499_v7 = vsel %vm476_vm0, %v475_v6, 0 }
 0x1b2   : > { %931 = vmatpush3.bf16.xpose.msra.mxu1 %v499_v7 }
 0x1b3   : > { %940 = vmatprep.subr.bf16.mxu1 %v460_v45 }
 0x1b9   : > { %933 = vmatmul.mubr.msk.bf16.vlgmr.msra.gmra.mrb[0].mxu1 %vm476_vm0, %v457_v49 }
 0x1ba   : > { %936 = vmatprep.mubr.msk.bf16.mxu1 %vm476_vm0, %v458_v55  ;;  %941 = vmatpush3.bf16.msra.mxu1 %v460_v45 }
 0x1bb   : > { %942 = vmatprep.subr.bf16.mxu1 %v461_v51 }
 0x1be   : > { %943 = vmatpush3.bf16.msra.mxu1 %v461_v51 }
 0x1bf   : > { %944 = vmatprep.subr.bf16.mxu1 %v462_v57 }
 0x1c1   : > { %937 = vmatmul.mubr.msk.bf16.gmra.mrb[4].mxu1 %vm476_vm0, %v459_v61 }
 0x1c2   : > { %945 = vmatpush3.bf16.msra.mxu1 %v462_v57 }
 0x1c3   : > { %946 = vmatprep.subr.bf16.mxu1 %v463_v63 }
 0x1c6   : > { %947 = vmatpush3.bf16.msra.mxu1 %v463_v63 }
 0x28c   : > { %v934_v13 = vpop.f32.mrb[0].mxu1 }
 0x28d   : > { %v535_v14 = vpop.f32.mrb[1].mxu1  ;;  %v587_v21 = vsel %vm579_vm2, %v934_v13, -inf }
 0x28e   : > { %v585_v16 = vsel %vm577_vm1, %v535_v14, -inf  ;;  %v935_v17 = vpop.f32.mrb[2].mxu1  ;;  %v599_v26 = vsel %vm476_vm0, %v587_v21, -inf }
 0x28f   : > { %v538_v18 = vpop.f32.mrb[3].mxu1  ;;  %v593_v19 = vsel %vm476_vm0, %v585_v16, -inf  ;;  %v588_v27 = vsel %vm580_vm4, %v935_v17, -inf }
 0x290   : > { %v586_v22 = vsel %vm578_vm3, %v538_v18, -inf  ;;  %594 = vmax.xlane.f32.xlu0 %v593_v19  ;;  %v602_v34 = vsel %vm476_vm0, %v588_v27, -inf }
 0x291   : > { %v596_v23 = vsel %vm476_vm0, %v586_v22, -inf }
 0x292   : > { %597 = vmax.xlane.f32.xlu1 %v596_v23 }
 0x294   : > { %600 = vmax.xlane.f32.xlu0 %v599_v26  ;;  %v938_v28 = vpop.f32.mrb[4].mxu1 }
 0x295   : > { %v551_v29 = vpop.f32.mrb[5].mxu1  ;;  %v591_v36 = vsel %vm583_vm6, %v938_v28, -inf }
 0x296   : > { %v589_v31 = vsel %vm581_vm5, %v551_v29, -inf  ;;  %v939_v32 = vpop.f32.mrb[6].mxu1  ;;  %v611_v38 = vsel %vm476_vm0, %v591_v36, -inf }
 0x297   : > { %v554_v33 = vpop.f32.mrb[7].mxu1  ;;  %v605_v35 = vsel %vm476_vm0, %v589_v31, -inf  ;;  %v592_v40 = vsel %vm584_vm8, %v939_v32, -inf }
 0x298   : > { %v590_v37 = vsel %vm582_vm7, %v554_v33, -inf  ;;  %603 = vmax.xlane.f32.xlu0 %v602_v34  ;;  %606 = vmax.xlane.f32.xlu1 %v605_v35  ;;  %v614_v41 = vsel %vm476_vm0, %v592_v40, -inf }
 0x299   : > { %v608_v39 = vsel %vm476_vm0, %v590_v37, -inf }
 0x29c   : > { %612 = vmax.xlane.f32.xlu1 %v611_v38  ;;  %609 = vmax.xlane.f32.xlu0 %v608_v39 }
 0x2a0   : > { %615 = vmax.xlane.f32.xlu0 %v614_v41 }
 0x31d   : > { %v595_v42 = vpop.xlane.xlu0 %594 }
 0x31e   : > { %v617_v43 = vsub.f32 %v585_v16, %v595_v42 }
 0x31f   : > { %v598_v44 = vpop.xlane.xlu1 %597 }
 0x320   : > { %v625_v45 = vmul.f32 1.442695, %v617_v43  ;;  %v618_v46 = vsub.f32 %v586_v22, %v598_v44 }
 0x321   : > { %v601_v47 = vpop.xlane.xlu0 %600 }
 0x322   : > { %1062 = vpow2.f32 %v625_v45  ;;  %v627_v48 = vmul.f32 1.442695, %v618_v46  ;;  %v619_v49 = vsub.f32 %v587_v21, %v601_v47 }
 0x324   : > { %1064 = vpow2.f32 %v627_v48  ;;  %v629_v50 = vmul.f32 1.442695, %v619_v49 }
 0x325   : > { %v604_v51 = vpop.xlane.xlu0 %603  ;;  %v607_v52 = vpop.xlane.xlu1 %606 }
 0x326   : > { %1066 = vpow2.f32 %v629_v50  ;;  %v620_v53 = vsub.f32 %v588_v27, %v604_v51  ;;  %v621_v54 = vsub.f32 %v589_v31, %v607_v52 }
 0x328   : > { %v631_v55 = vmul.f32 1.442695, %v620_v53  ;;  %v633_v56 = vmul.f32 1.442695, %v621_v54 }
 0x329   : > { %v613_v57 = vpop.xlane.xlu1 %612  ;;  %v610_v58 = vpop.xlane.xlu0 %609 }
 0x32a   : > { %1068 = vpow2.f32 %v631_v55  ;;  %v623_v59 = vsub.f32 %v591_v36, %v613_v57  ;;  %v622_v60 = vsub.f32 %v590_v37, %v610_v58 }
 0x32b   : > { %1070 = vpow2.f32 %v633_v56 }
 0x32c   : > { %v1063_v61 = vpop.eup %1062  ;;  %v637_v62 = vmul.f32 1.442695, %v623_v59  ;;  %v635_v63 = vmul.f32 1.442695, %v622_v60 }
 0x32d   : > { %v616_v0 = vpop.xlane.xlu0 %615  ;;  %v641_v1 = vsel %vm476_vm0, %v1063_v61, 0.0 }
 0x32e   : > { %v1065_v2 = vpop.eup %1064  ;;  %1072 = vpow2.f32 %v637_v62  ;;  %v624_v3 = vsub.f32 %v592_v40, %v616_v0  ;;  %642 = vadd.xlane.f32.xlu1 %v641_v1 }
 0x32f   : > { %1074 = vpow2.f32 %v635_v63  ;;  %v644_v4 = vsel %vm476_vm0, %v1065_v2, 0.0 }
 0x330   : > { %v1067_v5 = vpop.eup %1066  ;;  %v639_v6 = vmul.f32 1.442695, %v624_v3  ;;  %645 = vadd.xlane.f32.xlu0 %v644_v4 }
 0x331   : > { %v647_v7 = vsel %vm476_vm0, %v1067_v5, 0.0 }
 0x332   : > { %1076 = vpow2.f32 %v639_v6  ;;  %648 = vadd.xlane.f32.xlu1 %v647_v7 }
 0x334   : > { %v1069_v8 = vpop.eup %1068 }
 0x335   : > { %v1071_v9 = vpop.eup %1070  ;;  %v650_v10 = vsel %vm476_vm0, %v1069_v8, 0.0 }
 0x336   : > { %v653_v11 = vsel %vm476_vm0, %v1071_v9, 0.0  ;;  %651 = vadd.xlane.f32.xlu0 %v650_v10 }
 0x337   : > { %654 = vadd.xlane.f32.xlu1 %v653_v11 }
 0x338   : > { %v1073_v12 = vpop.eup %1072 }
 0x339   : > { %v1075_v13 = vpop.eup %1074  ;;  %v659_v14 = vsel %vm476_vm0, %v1073_v12, 0.0 }
 0x33a   : > { %v656_v15 = vsel %vm476_vm0, %v1075_v13, 0.0 }
 0x33b   : > { %660 = vadd.xlane.f32.xlu1 %v659_v14  ;;  %657 = vadd.xlane.f32.xlu0 %v656_v15 }
 0x33c   : > { %v1077_v16 = vpop.eup %1076 }
 0x33d   : > { %v662_v17 = vsel %vm476_vm0, %v1077_v16, 0.0 }
 0x33f   : > { %663 = vadd.xlane.f32.xlu0 %v662_v17 }
 0x3bb   : > { %v643_v18 = vpop.xlane.xlu1 %642 }
 0x3bc   : > { %1078 = vrcp.f32 %v643_v18 }
 0x3bd   : > { %v646_v19 = vpop.xlane.xlu0 %645 }
 0x3be   : > { %1080 = vrcp.f32 %v646_v19 }
 0x3bf   : > { %v649_v20 = vpop.xlane.xlu1 %648 }
 0x3c0   : > { %1082 = vrcp.f32 %v649_v20 }
 0x3c3   : > { %v652_v21 = vpop.xlane.xlu0 %651 }
 0x3c4   : > { %v655_v22 = vpop.xlane.xlu1 %654  ;;  %1084 = vrcp.f32 %v652_v21 }
 0x3c5   : > { %1086 = vrcp.f32 %v655_v22 }
 0x3c6   : > { %v1079_v23 = vpop.eup %1078 }
 0x3c7   : > { %v673_v27 = vmul.f32 %v1079_v23, %v1063_v61 }
 0x3c8   : > { %v1081_v24 = vpop.eup %1080  ;;  %v661_v25 = vpop.xlane.xlu1 %660 }
 0x3c9   : > { %v658_v26 = vpop.xlane.xlu0 %657  ;;  %v674_v28 = vmul.f32 %v1081_v24, %v1065_v2 }
 0x3ca   : > { %1088 = vrcp.f32 %v658_v26  ;;  %v1083_v30 = vpop.eup %1082 }
 0x3cb   : > { %1090 = vrcp.f32 %v661_v25  ;;  %v681_v29 = vpack.c.bf16 %v674_v28, %v673_v27  ;;  %v675_v33 = vmul.f32 %v1083_v30, %v1067_v5 }
 0x3cd   : > { %v664_v31 = vpop.xlane.xlu0 %663  ;;  %948 = vmatprep.mubr.msk.bf16.mxu1 %vm476_vm0, %v681_v29 }
 0x3ce   : > { %1092 = vrcp.f32 %v664_v31  ;;  %v1085_v32 = vpop.eup %1084 }
 0x3cf   : > { %v676_v34 = vmul.f32 %v1085_v32, %v1069_v8  ;;  %v1087_v36 = vpop.eup %1086 }
 0x3d0   : > { %v677_v39 = vmul.f32 %v1087_v36, %v1071_v9 }
 0x3d1   : > { %v682_v35 = vpack.c.bf16 %v676_v34, %v675_v33 }
 0x3d3   : > { %949 = vmatmul.mubr.msk.bf16.vlgmr.msra.gmra.mrb[8].mxu1 %vm476_vm0, %v682_v35 }
 0x3d4   : > { %v1089_v37 = vpop.eup %1088 }
 0x3d5   : > { %v1091_v38 = vpop.eup %1090  ;;  %v678_v40 = vmul.f32 %v1089_v37, %v1075_v13 }
 0x3d6   : > { %v679_v43 = vmul.f32 %v1091_v38, %v1073_v12 }
 0x3d7   : > { %v683_v42 = vpack.c.bf16 %v678_v40, %v677_v39 }
 0x3d8   : > { %v1093_v41 = vpop.eup %1092 }
 0x3d9   : > { %v680_v44 = vmul.f32 %v1093_v41, %v1077_v16  ;;  %952 = vmatprep.mubr.msk.bf16.mxu1 %vm476_vm0, %v683_v42 }
 0x3db   : > { %v684_v45 = vpack.c.bf16 %v680_v44, %v679_v43 }
 0x3dd   : > { %953 = vmatmul.mubr.msk.bf16.gmra.mrb[12].mxu1 %vm476_vm0, %v684_v45 }
 0x4a6   : > { %v950_v46 = vpop.f32.mrb[8].mxu1 }
 0x4a7   : > { %764 = vst.msk [vmem:[%s136_s14 + $0x10] sm:$0xff] %vm476_vm0, %v950_v46  ;;  %v731_v47 = vpop.f32.mrb[9].mxu1 }
 0x4a8   : > { %762 = vst.msk [vmem:[%s136_s14] sm:$0xff] %vm476_vm0, %v731_v47  ;;  %v951_v48 = vpop.f32.mrb[10].mxu1 }
 0x4a9   : > { %765 = vst.msk [vmem:[%s136_s14 + $0x18] sm:$0xff] %vm476_vm0, %v951_v48  ;;  %v734_v49 = vpop.f32.mrb[11].mxu1 }
 0x4aa   : > { %763 = vst.msk [vmem:[%s136_s14 + $0x8] sm:$0xff] %vm476_vm0, %v734_v49 }
 0x4b0   : > { %v954_v50 = vpop.f32.mrb[12].mxu1 }
 0x4b1   : > { %768 = vst.msk [vmem:[%s136_s14 + $0x30] sm:$0xff] %vm476_vm0, %v954_v50  ;;  %v747_v51 = vpop.f32.mrb[13].mxu1 }
 0x4b2   : > { %766 = vst.msk [vmem:[%s136_s14 + $0x20] sm:$0xff] %vm476_vm0, %v747_v51  ;;  %v955_v52 = vpop.f32.mrb[14].mxu1 }
 0x4b3   : > { %769 = vst.msk [vmem:[%s136_s14 + $0x38] sm:$0xff] %vm476_vm0, %v955_v52  ;;  %v750_v53 = vpop.f32.mrb[15].mxu1 }
 0x4b4   : > { %767 = vst.msk [vmem:[%s136_s14 + $0x28] sm:$0xff] %vm476_vm0, %v750_v53 }
 0x4b5   : > { %1107 = shalt.err (!%p1104_p3)
}
 0x4b6   : > { %s1108_s28 = scalar_lea.hbm %s1378_s23, 1024  ;;  %s1112_s4 = scalar_lea.hbm %s1428_s2, 2048 }
 0x4b7   : > { %p1109_p4 = scmp.ne.s32.totalorder %s1378_s23, %s1108_s28  ;;  %p1113_p9 = scmp.lt.u32.totalorder %s1378_s23, %s1428_s2 }
 0x4b8   : > { %p1114_p10 = scmp.lt.u32.totalorder %s1112_s4, %s1108_s28  ;;  %p1116_p12 = scmp.lt.u32.totalorder %s1108_s28, %s1378_s23 }
 0x4b9   : > { %p1110_p7 = pnand %p1109_p4, %p1215_p5 }
 0x4ba   : > { %p1115_p11 = por %p1114_p10, %p1113_p9 }
 0x4bb   : > { %p1111_p8 = pneg %p1110_p7 }
 0x4bc   : > { %p1117_p13 = por %p1116_p12, %p1115_p11 }
 0x4be   : > { %p1118_p0 = pnand %p1117_p13, %p1111_p8 }
 0x4c0   : > { %1121 = shalt.err (!%p1118_p0)
}
 0x4c1   : > { %s1160_s7 = smov 128   ;;  %s1161_s30 = smov 8  }
 0x4c2   : > { %960 = dma.vmem_to_hbm [thread:$0]  (%p1215_p5), %s1380_s17, 1024, %s1378_s23, %s1385_s13, %s1160_s7, %s1160_s7, %s1161_s30  }
 0x4c3 PF: > { %p966_p1 = scmp.ge.s32.totalorder %s1156_s12, 2  ;;  %s799_s8 = sand.u32 1, %s1144_s9  }
 0x4c4   : > { %s800_s14 = scalar_lea.sflag [#allocation3], %s799_s8 }
 0x4c5   : > { %p963_p2 = pnand %p966_p1, %p1219_p6 }
 0x4c7   : > { %1139 = dma.done.wait (!%p963_p2), %s800_s14, 1024  }
 0x4c8   : > { %1141 = vsyncadd (!%p963_p2), %s800_s14, 4294966272  ;;  %p12_p3 = scmp.ge.s32.totalorder %s1202_s15, 4   ;;  %s1431_s9 = smov %s1148_s10 }
 0x4c9   : > { %s1432_s10 = smov %s1152_s11  ;;  %s1433_s11 = smov %s1213_s18 }
 0x4ca   : > { %s1434_s12 = smov %s1202_s15  ;;  %14 = sbr.rel (!%p12_p3) target bundleno = 3 (0x3), region = 63 }
 0x4d1   :  { %805 = vsyncpa [#allocation3], 1 }
 0x4d2   :  { %807 = vsyncpa [#allocation3 + $0x1], 1 }

</bundles_post_ra>
